<compile_context>
chip_gen: v7x
topology: tpu7x:2x2x1
jax: 0.10.0
libtpu: 0.0.40
codegen_flags: <defaults>
</compile_context>

<pallas_src>
import numpy as np
import jax
import jax.numpy as jnp
from jax import lax
from jax.experimental import pallas as pl
from jax.experimental.pallas import tpu as pltpu

BN_EPS = 1e-3
LANE = 128


def _round_up(n, m):
    return -(-n // m) * m


# --------------------------------------------------------------------------
# Host-side constants (built once, at module init).
# --------------------------------------------------------------------------
def interp_matrix_np(src, dst):
    """Bilinear interpolation matrix (dst, src), align_corners=True."""
    A = np.zeros((dst, src), np.float32)
    if dst == 1:
        coords = np.zeros((1,), np.float64)
    else:
        coords = np.arange(dst, dtype=np.float64) * (src - 1) / (dst - 1)
    i0 = np.floor(coords).astype(np.int64)
    i1 = np.minimum(i0 + 1, src - 1)
    w1 = (coords - i0).astype(np.float32)
    w0 = 1.0 - w1
    rows = np.arange(dst)
    np.add.at(A, (rows, i0), w0)
    np.add.at(A, (rows, i1), w1)
    return A


def shift_masks_np(H, W, pad_w):
    """(9, pad_w) border masks for the 3x3 taps, flat row-major; 0 in padding."""
    HW = H * W
    h = np.arange(HW) // W
    w = np.arange(HW) % W
    masks = np.zeros((9, pad_w), np.float32)
    t = 0
    for dy in (-1, 0, 1):
        for dx in (-1, 0, 1):
            valid = (h + dy >= 0) & (h + dy < H) & (w + dx >= 0) & (w + dx < W)
            masks[t, :HW] = valid.astype(np.float32)
            t += 1
    return masks


# --------------------------------------------------------------------------
# Parameter folding (host side, once per weight update).
# --------------------------------------------------------------------------
def fold_bn(gamma, beta, mean, var):
    scale = gamma / jnp.sqrt(var + BN_EPS)
    shift = beta - mean * scale
    return scale, shift


def fold_params(params, num_layers, pyramid_levels, in_ch):
    C = in_ch
    # depthwise taps (L, C, 9), tap index t = (dy+1)*3 + (dx+1); stays f32 (VPU)
    dw = jnp.stack([params['dw'][i][:, 0].reshape(C, 9)
                    for i in range(num_layers)])
    pw_lvls, sh_lvls = [], []
    for lvl in range(pyramid_levels):
        pw_l, sh_l = [], []
        for i in range(num_layers):
            scale, shift = fold_bn(params['bn_gamma'][lvl][i],
                                   params['bn_beta'][lvl][i],
                                   params['bn_mean'][lvl][i],
                                   params['bn_var'][lvl][i])
            Wp = params['pw_w'][i][:, :, 0, 0]                         # (C, C)
            pw_l.append(scale[:, None] * Wp)                           # BN folded
            sh_l.append((scale * params['pw_b'][i] + shift)[:, None])  # (C, 1)
        pw_lvls.append(jnp.stack(pw_l))
        sh_lvls.append(jnp.stack(sh_l))
    pw = jnp.stack(pw_lvls).astype(jnp.bfloat16)    # (n_lvl, L, C, C) MXU operand
    sh = jnp.stack(sh_lvls)                         # (n_lvl, L, C, 1) f32
    out_w = params['out_w'][:, :, 0, 0]             # (Cout, 4C)
    ow = jnp.stack([out_w[:, l * C:(l + 1) * C] for l in range(pyramid_levels)]
                   ).astype(jnp.bfloat16)           # (n_lvl, Cout, C) MXU operand
    ob = params['out_b'][:, None]                   # (Cout, 1) f32
    return dw, pw, sh, ow, ob


# --------------------------------------------------------------------------
# Roll-direction calibration (perf-review correctness note: the lane rotation
# must reproduce y[:, p] = x[:, (p + delta) % n]).  One-off tiny probe kernel.
# --------------------------------------------------------------------------
def _roll_shift_sign():
    def k(x_ref, o_ref):
        o_ref[...] = pltpu.roll(x_ref[...], 1, 1)
    x = jnp.broadcast_to(jnp.arange(128, dtype=jnp.float32), (8, 128))
    y = pl.pallas_call(k, out_shape=jax.ShapeDtypeStruct((8, 128), jnp.float32))(x)
    # np.roll convention: y[0, 0] == x[0, 127] == 127  ->  shift = -delta.
    return -1 if int(y[0, 0]) == 127 else 1


# --------------------------------------------------------------------------
# Fused Pallas kernel: whole Segment_Head forward, grid=(batch,).
# --------------------------------------------------------------------------
def build_segment_head_forward(img_size, in_ch, out_ch, num_layers, level_hw):
    S = img_size
    P = S * S
    L = num_layers
    C = in_ch
    n_lvl = len(level_hw)

    # ---- static structure: unique resolutions, lane padding, tap deltas ----
    uniq, lvl_to_uniq = [], []
    for hw in level_hw:
        if hw not in uniq:
            uniq.append(hw)
        lvl_to_uniq.append(uniq.index(hw))
    n_uniq = len(uniq)
    pad_w_uniq = [_round_up(h * w, LANE) for (h, w) in uniq]
    lvl_off, acc_off = [], 0
    for lvl in range(n_lvl):
        lvl_off.append(acc_off)
        acc_off += pad_w_uniq[lvl_to_uniq[lvl]]
    total_w = acc_off
    deltas_uniq = [[dy * W + dx for dy in (-1, 0, 1) for dx in (-1, 0, 1)]
                   for (_, W) in uniq]
    # unique resolutions needing a resize matmul ((H,W)==(S,S) is the identity)
    rt_pos = {}
    for u, hw in enumerate(uniq):
        if hw != (S, S):
            rt_pos[u] = len(rt_pos)
    n_rt = len(rt_pos)

    # ---- constants (per unique resolution, deduplicated) -------------------
    masks_uniq = [jnp.asarray(shift_masks_np(h, w, pad_w_uniq[u]))
                  for u, (h, w) in enumerate(uniq)]
    rts = []
    for u, (H, W) in enumerate(uniq):
        if u in rt_pos:
            Ah = interp_matrix_np(H, S)                        # (S, H)
            Aw = interp_matrix_np(W, S)                        # (S, W)
            RT = np.kron(Ah, Aw).T.astype(np.float32)          # (H*W, S*S)
            rts.append(jnp.asarray(RT, dtype=jnp.bfloat16))    # bf16 MXU operand

    sgn = _roll_shift_sign()   # lane-roll direction (see _roll_shift_sign)

    def kernel(*refs):
        x_ref = refs[0]
        m_refs = refs[1:1 + n_uniq]
        rt_refs = refs[1 + n_uniq:1 + n_uniq + n_rt]
        dw_ref, pw_ref, sh_ref, ow_ref, ob_ref, o_ref = refs[1 + n_uniq + n_rt:]

        x_all = x_ref[0]               # (C, total_w) f32, spatial on lanes
        dw_all = dw_ref[...]           # (L, C, 9) f32
        proj = [None] * n_uniq         # per-resolution (Cout, HW) accumulators

        for lvl in range(n_lvl):
            u = lvl_to_uniq[lvl]
            H, W = uniq[u]
            HW = H * W
            padw = pad_w_uniq[u]
            off = lvl_off[lvl]
            x = x_all[:, off:off + padw]                # aligned 128-lane slice
            m = m_refs[u][...]                          # (9, padw)
            mrows = [m[t:t + 1, :] for t in range(9)]   # hoisted out of L loop

            for i in range(L):
                # depthwise 3x3 "same": centre tap + 8 masked lane-rolled taps.
                # Need y[:, p] = x[:, (p + delta) % padw]; every wrapped lane is
                # zeroed by the border mask, so rolling over the padded width is
                # exact for all valid positions.
                acc = x * dw_all[i, :, 4:5]             # centre tap (mask == 1)
                for t in (0, 1, 2, 3, 5, 6, 7, 8):
                    rolled = pltpu.roll(x, (sgn * deltas_uniq[u][t]) % padw, 1)
                    acc = acc + rolled * mrows[t] * dw_all[i, :, t:t + 1]
                # pointwise 1x1 + folded BN: bf16 MXU operands, f32 accumulate
                y = jnp.dot(pw_ref[lvl, i], acc.astype(jnp.bfloat16),
                            preferred_element_type=jnp.float32)
                y = y + sh_ref[lvl, i]                  # (C, 1) lane broadcast
                x = y * jax.nn.sigmoid(y)               # swish (f32 VPU/EUP)

            # final 1x1 outconv applied BEFORE the resize (associativity);
            # levels sharing a resolution accumulate into one projection.
            p_l = jnp.dot(ow_ref[lvl], x[:, :HW].astype(jnp.bfloat16),
                          preferred_element_type=jnp.float32)    # (Cout, HW)
            proj[u] = p_l if proj[u] is None else proj[u] + p_l

        # epilogue: one resize matmul per non-identity resolution, + bias.
        out = None
        for u in range(n_uniq):
            if u in rt_pos:
                contrib = jnp.dot(proj[u].astype(jnp.bfloat16),
                                  rt_refs[rt_pos[u]][...],
                                  preferred_element_type=jnp.float32)
            else:
                contrib = proj[u]      # (H, W) == (S, S): resize is the identity
            out = contrib if out is None else out + contrib
        o_ref[0] = out + ob_ref[...]                    # (Cout, P) + (Cout, 1)

    def forward(xs_nchw, dw, pw, sh, ow, ob):
        B = xs_nchw[0].shape[0]
        # One lane-dense input operand: flatten each level, zero-pad to a
        # multiple of 128 lanes, concat along lanes (1 input DMA instead of 4).
        segs = []
        for lvl, (xl, (h, w)) in enumerate(zip(xs_nchw, level_hw)):
            hw = h * w
            padw = pad_w_uniq[lvl_to_uniq[lvl]]
            xf = xl.reshape(B, C, hw)
            if padw > hw:
                xf = jnp.pad(xf, ((0, 0), (0, 0), (0, padw - hw)))
            segs.append(xf)
        x_cat = jnp.concatenate(segs, axis=-1)          # (B, C, total_w)

        in_specs = (
            [pl.BlockSpec((1, C, total_w), lambda b: (b, 0, 0))]
            + [pl.BlockSpec(m.shape, lambda b: (0, 0)) for m in masks_uniq]
            + [pl.BlockSpec(r.shape, lambda b: (0, 0)) for r in rts]
            + [pl.BlockSpec(dw.shape, lambda b: (0, 0, 0)),
               pl.BlockSpec(pw.shape, lambda b: (0, 0, 0, 0)),
               pl.BlockSpec(sh.shape, lambda b: (0, 0, 0, 0)),
               pl.BlockSpec(ow.shape, lambda b: (0, 0, 0)),
               pl.BlockSpec(ob.shape, lambda b: (0, 0))])
        out = pl.pallas_call(
            kernel,
            out_shape=jax.ShapeDtypeStruct((B, out_ch, P), jnp.float32),
            grid=(B,),
            in_specs=in_specs,
            out_specs=pl.BlockSpec((1, out_ch, P), lambda b: (b, 0, 0)),
            compiler_params=pltpu.CompilerParams(
                dimension_semantics=("parallel",)),      # v7x megacore
        )(x_cat, *masks_uniq, *rts, dw, pw, sh, ow, ob)
        return out.reshape(B, out_ch, S, S)

    return forward


# --------------------------------------------------------------------------
# Parameter init + pure-JAX (XLA) reference matching the PyTorch module.
# --------------------------------------------------------------------------
def init_params(key, in_ch, out_ch, num_layers, pyramid_levels):
    C = in_ch
    keys = iter(jax.random.split(key, 512))
    nk = lambda: next(keys)
    dw = [0.3 * jax.random.normal(nk(), (C, 1, 3, 3), jnp.float32)
          for _ in range(num_layers)]
    pw_w = [(1.0 / np.sqrt(C)) * jax.random.normal(nk(), (C, C, 1, 1), jnp.float32)
            for _ in range(num_layers)]
    pw_b = [0.1 * jax.random.normal(nk(), (C,), jnp.float32)
            for _ in range(num_layers)]
    bn_gamma = [[jax.random.uniform(nk(), (C,), jnp.float32, 0.8, 1.2)
                 for _ in range(num_layers)] for _ in range(pyramid_levels)]
    bn_beta = [[0.1 * jax.random.normal(nk(), (C,), jnp.float32)
                for _ in range(num_layers)] for _ in range(pyramid_levels)]
    bn_mean = [[0.1 * jax.random.normal(nk(), (C,), jnp.float32)
                for _ in range(num_layers)] for _ in range(pyramid_levels)]
    bn_var = [[jax.random.uniform(nk(), (C,), jnp.float32, 0.5, 1.5)
               for _ in range(num_layers)] for _ in range(pyramid_levels)]
    out_w = (1.0 / np.sqrt(4 * C)) * jax.random.normal(
        nk(), (out_ch, 4 * C, 1, 1), jnp.float32)
    out_b = 0.1 * jax.random.normal(nk(), (out_ch,), jnp.float32)
    return dict(dw=dw, pw_w=pw_w, pw_b=pw_b, bn_gamma=bn_gamma, bn_beta=bn_beta,
                bn_mean=bn_mean, bn_var=bn_var, out_w=out_w, out_b=out_b)


def reference_forward(inputs_nchw, params, img_size, num_layers, in_ch):
    feats = []
    for lvl, x in enumerate(inputs_nchw):
        for i in range(num_layers):
            x = lax.conv_general_dilated(
                x, params['dw'][i], (1, 1), [(1, 1), (1, 1)],
                dimension_numbers=('NCHW', 'OIHW', 'NCHW'),
                feature_group_count=in_ch)
            x = lax.conv_general_dilated(
                x, params['pw_w'][i], (1, 1), 'VALID',
                dimension_numbers=('NCHW', 'OIHW', 'NCHW'))
            x = x + params['pw_b'][i][None, :, None, None]
            scale, shift = fold_bn(params['bn_gamma'][lvl][i],
                                   params['bn_beta'][lvl][i],
                                   params['bn_mean'][lvl][i],
                                   params['bn_var'][lvl][i])
            x = x * scale[None, :, None, None] + shift[None, :, None, None]
            x = x * jax.nn.sigmoid(x)
        Ah = jnp.asarray(interp_matrix_np(x.shape[2], img_size))
        Aw = jnp.asarray(interp_matrix_np(x.shape[3], img_size))
        x = jnp.einsum('sh,bchw->bcsw', Ah, x)
        x = jnp.einsum('tw,bcsw->bcst', Aw, x)
        feats.append(x)
    cat = jnp.concatenate(feats, axis=1)
    out = lax.conv_general_dilated(
        cat, params['out_w'], (1, 1), 'VALID',
        dimension_numbers=('NCHW', 'OIHW', 'NCHW'))
    return out + params['out_b'][None, :, None, None]


if __name__ == "__main__":
    img_size, in_ch, out_ch = 16, 8, 3
    num_layers, pyramid_levels, batch = 2, 4, 2
    spatial = [16, 8, 8, 4]                    # per-level feature resolutions
    level_hw = [(s, s) for s in spatial]

    key = jax.random.PRNGKey(0)
    k_in, k_par = jax.random.split(key)
    in_keys = jax.random.split(k_in, pyramid_levels)
    inputs = [jax.random.normal(in_keys[l],
                                (batch, in_ch, spatial[l], spatial[l]), jnp.float32)
              for l in range(pyramid_levels)]
    params = init_params(k_par, in_ch, out_ch, num_layers, pyramid_levels)

    # Built once at "module init": folded weights + constants + kernel closure.
    dw, pw, sh, ow, ob = fold_params(params, num_layers, pyramid_levels, in_ch)
    forward = build_segment_head_forward(img_size, in_ch, out_ch,
                                         num_layers, level_hw)

    out = forward(inputs, dw, pw, sh, ow, ob)
    out = jax.block_until_ready(out)

    ref = reference_forward(inputs, params, img_size, num_layers, in_ch)
    ref = jax.block_until_ready(ref)

    assert out.shape == (batch, out_ch, img_size, img_size), out.shape
    err = float(jnp.max(jnp.abs(out - ref)))
    # bf16 MXU operands (per perf review) -> looser tolerance than the f32 path;
    # accumulation stays f32 so the error is a few bf16 ulps of O(1) activations.
    tol = 3e-2 * (1.0 + float(jnp.max(jnp.abs(ref))))
    assert err < tol, f"max abs err {err} exceeds tolerance {tol}"
    print("KERNEL_OK")
</pallas_src>

<mosaic_0001>
module attributes {stable_mosaic.version = 11 : i64} {
  func.func @k(%arg0: memref<8x128xf32, #tpu.memory_space<vmem>>, %arg1: memref<8x128xf32, #tpu.memory_space<vmem>>) attributes {dimension_semantics = [], scalar_prefetch = 0 : i64, scratch_operands = 0 : i64, tpu.core_type = #tpu.core_type<tc>} {
    %c0 = arith.constant 0 : index
    %c0_0 = arith.constant 0 : index
    %0 = vector.load %arg0[%c0, %c0_0] : memref<8x128xf32, #tpu.memory_space<vmem>>, vector<8x128xf32>
    %c1_i32 = arith.constant 1 : i32
    %1 = tpu.dynamic_rotate %0 by %c1_i32 dim 1 : vector<8x128xf32>, i32 -> vector<8x128xf32>
    %c0_1 = arith.constant 0 : index
    %c0_2 = arith.constant 0 : index
    %2 = vector.load %arg1[%c0_1, %c0_2] : memref<8x128xf32, #tpu.memory_space<vmem>>, vector<8x128xf32>
    tpu.vector_store %arg1[%c0_1, %c0_2], %1 {strides = array<i32>} : memref<8x128xf32, #tpu.memory_space<vmem>>, vector<8x128xf32>,
    return
  }
}

</mosaic_0001>

<bundles_post_ra>
// kernel: tpu_custom_call.1
= control target key start
LH: loop header
LB: loop body
LE: loop exit
PB: predicated region body
PF: predicated region fallthrough
CT: control target
= control target key end

     0   :  { %6 = vsyncpa [#allocation3], 0  ;;  %s128_s0 = inlined_call_operand.hbm [shape: f32[8,128], index: 0, kind: input, shape index: {}]   ;;  %s129_s1 = inlined_call_operand.hbm [shape: f32[8,128], index: 1, kind: output, shape index: {}]  }
   0x1   :  { %7 = vsyncpa [#allocation4], 0  ;;  %s91_s6 = smov [#allocation2]   ;;  %s43_s10 = scalar_lea.hbm %s128_s0, 128 }
   0x2   :  { %s14_s7 = sshll.u32 %s91_s6, 4  ;;  %p44_p0 = scmp.ne.s32.totalorder %s128_s0, %s43_s10  ;;  %s15_s7 = int_to_ptr.vmem [resolvable:$true] %s14_s7 }
   0x3   :  { %p47_p1 = scmp.lt.u32.totalorder %s43_s10, %s128_s0 }
   0x5   :  { %p49_p2 = pnand %p47_p1, %p44_p0 }
   0x7   :  { %52 = shalt.err (!%p49_p2)
}
   0x8   :  { %s53_s15 = scalar_lea.vmem %s15_s7, 128  ;;  %p58_p4 = scmp.lt.s32.totalorder %s15_s7, %s15_s7 }
   0x9   :  { %p54_p3 = scmp.ne.s32.totalorder %s15_s7, %s53_s15  ;;  %p59_p5 = scmp.lt.s32.totalorder %s53_s15, %s53_s15 }
   0xb   :  { %p60_p6 = por %p59_p5, %p58_p4 }
   0xd   :  { %p61_p7 = pnand %p60_p6, %p54_p3 }
   0xf   :  { %64 = shalt.err (!%p61_p7)
}
  0x10   :  { %17 = dma.hbm_to_vmem [thread:$0]  %s128_s0, 128, %s15_s7, [#allocation3]  }
  0x11   :  { %87 = dma.done.wait [#allocation3], 128  }
  0x12   :  { %88 = vsyncadd [#allocation3], 4294967168  ;;  %v21_v0 = vld [vmem:[#allocation2] sm:$0xff]  ;;  %s92_s18 = smov 1   ;;  %s93_s19 = smov [#allocation5]  }
  0x13   :  { %22 = vrot.lane.b32.xlu0 %v21_v0, %s92_s18  ;;  %s31_s20 = sshll.u32 %s93_s19, 4  ;;  %s32_s20 = int_to_ptr.vmem [resolvable:$true] %s31_s20 }
  0x14   :  { %s65_s21 = scalar_lea.vmem %s32_s20, 128  ;;  %p70_p9 = scmp.lt.s32.totalorder %s32_s20, %s32_s20 }
  0x15   :  { %p66_p8 = scmp.ne.s32.totalorder %s32_s20, %s65_s21  ;;  %p71_p10 = scmp.lt.s32.totalorder %s65_s21, %s65_s21 }
  0x17   :  { %p72_p11 = por %p71_p10, %p70_p9 }
  0x19   :  { %p73_p12 = pnand %p72_p11, %p66_p8 }
  0x85   :  { %v23_v1 = vpop.permute.xlu0 %22 }
  0x86   :  { %24 = vst [vmem:[#allocation5] sm:$0xff] %v23_v1 }
  0x87   :  { %76 = shalt.err (!%p73_p12)
}
  0x88   :  { %s77_s0 = scalar_lea.hbm %s129_s1, 128 }
  0x89   :  { %p78_p13 = scmp.ne.s32.totalorder %s129_s1, %s77_s0  ;;  %p81_p0 = scmp.lt.u32.totalorder %s77_s0, %s129_s1 }
  0x8b   :  { %p83_p1 = pnand %p81_p0, %p78_p13 }
  0x8d   :  { %86 = shalt.err (!%p83_p1)
}
  0x8e   :  { %34 = dma.vmem_to_hbm [thread:$0]  %s32_s20, 128, %s129_s1, [#allocation4]  }
  0x8f   :  { %89 = dma.done.wait [#allocation4], 128  }
  0x90   :  { %90 = vsyncadd [#allocation4], 4294967168 }
  0x91   :  { %38 = vsyncpa [#allocation3], 1 }
  0x92   :  { %39 = vsyncpa [#allocation4], 1 }

</bundles_post_ra>
